<compile_context>
chip_gen: v5e
topology: v5e:2x2
jax: 0.10.0
libtpu: 0.0.40
codegen_flags: <defaults>
</compile_context>

<pallas_src>
import jax
import jax.numpy as jnp
from jax.experimental import pallas as pl
from jax.experimental.pallas import tpu as pltpu

HIDDEN_DIM = 32
VOCAB_SIZE = 30522


def init_params(key, hidden_dim=HIDDEN_DIM, vocab_size=VOCAB_SIZE):
    """Parameters matching TextProcessor.__init__ shapes.

    forward() never reads them (the PyTorch forward is identity), so this is
    provided only for API parity and is intentionally NOT called in the demo
    below (per perf feedback: don't burn HBM + RNG kernels on dead weights).
    """
    k_emb, k_w, _ = jax.random.split(key, 3)
    return {
        "embedding.weight": jax.random.normal(k_emb, (vocab_size, hidden_dim), jnp.float32),
        "encoder.weight": jax.random.normal(k_w, (hidden_dim, hidden_dim), jnp.float32) * 0.02,
        "encoder.bias": jnp.zeros((hidden_dim,), jnp.float32),
    }


def _identity_kernel(x_ref, o_ref, flag_ref):
    # o_ref's HBM buffer aliases x_ref's (input_output_aliases={0: 0}), so the
    # output already holds the input bytes: nothing to load, compute, or store.
    # The single SMEM scalar store below is a trivially-lowerable marker op so
    # the kernel body is non-empty; it never touches the HBM operands.
    del x_ref, o_ref
    flag_ref[0] = jnp.int32(0)


def text_processor_forward(x, params=None, *, use_pallas=True):
    """Pallas implementation of TextProcessor.forward (identity).

    `params` is accepted for API parity but unused, exactly as in the PyTorch
    module's forward().  With `use_pallas=False` this returns `x` directly
    (the zero-overhead production path).  With `use_pallas=True` it goes
    through a pallas_call whose output aliases the input, so the kernel itself
    performs no data movement (no HBM<->VMEM DMA, no output allocation); under
    jit with the input donated the whole thing is free.
    """
    if not use_pallas:
        return x

    return pl.pallas_call(
        _identity_kernel,
        out_shape=jax.ShapeDtypeStruct(x.shape, x.dtype),
        # Leave both operands in place: no automatic HBM<->VMEM pipelining.
        in_specs=[pl.BlockSpec(memory_space=pl.ANY)],
        out_specs=pl.BlockSpec(memory_space=pl.ANY),
        # Output buffer IS the input buffer: identity with zero traffic.
        input_output_aliases={0: 0},
        scratch_shapes=[pltpu.SMEM((1,), jnp.int32)],
    )(x)


if __name__ == "__main__":
    key = jax.random.PRNGKey(0)
    k_params, k_x = jax.random.split(key)

    # Per the perf feedback, the dead Embedding/Linear parameters are not
    # materialized here; init_params(k_params) exists only for API parity.

    # Small text-like input: batch=2, seq=8 token ids.
    x = jax.random.randint(k_x, (2, 8), minval=0, maxval=VOCAB_SIZE, dtype=jnp.int32)
    # Regenerate the expected values independently of x's buffer so the check
    # does not depend on x after it feeds an aliasing pallas_call.
    expected = jax.random.randint(k_x, (2, 8), minval=0, maxval=VOCAB_SIZE, dtype=jnp.int32)

    out = text_processor_forward(x, params=None)
    out = jax.block_until_ready(out)

    assert out.shape == expected.shape and out.dtype == expected.dtype
    assert bool(jnp.all(out == expected))

    print("KERNEL_OK")
</pallas_src>

<mosaic_0001>
module attributes {stable_mosaic.version = 11 : i64} {
  func.func @_identity_kernel(%arg0: memref<2x8xi32, #tpu.memory_space<any>>, %arg1: memref<2x8xi32, #tpu.memory_space<any>>, %arg2: memref<1xi32, #tpu.memory_space<smem>>) attributes {dimension_semantics = [], scalar_prefetch = 0 : i64, scratch_operands = 1 : i64, tpu.core_type = #tpu.core_type<tc>} {
    %c0_i32 = arith.constant 0 : i32
    %c0 = arith.constant 0 : index
    %0 = memref.load %arg2[%c0] : memref<1xi32, #tpu.memory_space<smem>>
    memref.store %c0_i32, %arg2[%c0] : memref<1xi32, #tpu.memory_space<smem>>
    return
  }
}

</mosaic_0001>

<bundles_post_ra>
// kernel: tpu_custom_call.1
= control target key start
LH: loop header
LB: loop body
LE: loop exit
PB: predicated region body
PF: predicated region fallthrough
CT: control target
= control target key end

     0   :  { %s18_s0 = inlined_call_operand.hbm [shape: s32[2,8], index: 0, kind: input, shape index: {}, may-alias: {0,1}]   ;;  %s19_s1 = inlined_call_operand.hbm [shape: s32[2,8], index: 1, kind: output, shape index: {}, may-alias: {0,1}]  }

</bundles_post_ra>
